<compile_context>
chip_gen: v6e
topology: v6e:2x2x1
jax: 0.10.0
libtpu: 0.0.40
codegen_flags: <defaults>
</compile_context>

<pallas_src>
import math

import jax
import jax.numpy as jnp
from jax.experimental import pallas as pl
from jax.experimental.pallas import tpu as pltpu

_SQRT_HALF = 1.0 / math.sqrt(2.0)


def _gelu_exact_f32(h):
    # nn.GELU() default = exact erf formulation; keep the pointwise math in f32.
    return 0.5 * h * (1.0 + jax.lax.erf(h * _SQRT_HALF))


def ffn_kernel(x_ref, w1_ref, b1_ref, w2_ref, b2_ref, o_ref, acc_ref):
    """One (row-tile i, hidden-tile kf) grid step of fc1 -> GELU -> fc2.

    x_ref:  (tm, E)  row tile (block index constant over kf -> no re-DMA per kf)
    w1_ref: (E, tf)  fc1 weight column block
    b1_ref: (1, tf)  fc1 bias block
    w2_ref: (tf, E)  fc2 weight row block
    b2_ref: (1, E)   fc2 bias
    o_ref:  (tm, E)  output row tile
    acc_ref:(tm, E)  f32 accumulator scratch, carried across the kf axis
    """
    kf = pl.program_id(1)

    @pl.when(kf == 0)
    def _():
        acc_ref[...] = jnp.zeros_like(acc_ref)

    x = x_ref[...]  # native dtype -> full-rate MXU; f32 accumulation below.

    # fc1 partial: (tm, tf)
    h = jnp.dot(x, w1_ref[...], preferred_element_type=jnp.float32)
    h = h + b1_ref[...].astype(jnp.float32)

    # exact GELU (matches nn.GELU() default), f32
    h = _gelu_exact_f32(h)

    # dropout -> identity (inference)

    # fc2 partial sum over this hidden-dim block (cast back to native dtype for MXU)
    h = h.astype(x.dtype)
    acc_ref[...] += jnp.dot(h, w2_ref[...], preferred_element_type=jnp.float32)

    @pl.when(kf == pl.num_programs(1) - 1)
    def _():
        out = acc_ref[...] + b2_ref[...].astype(jnp.float32)
        # dropout -> identity (inference)
        o_ref[...] = out.astype(o_ref.dtype)


def _vmem_capacity_bytes():
    """Per-core VMEM capacity; conservative (v7x, 64 MiB) default if unknown."""
    try:
        return int(pltpu.get_tpu_info().vmem_capacity_bytes)
    except Exception:
        return 64 * 1024 * 1024


def _row_granularity(dtype):
    # Sublane packing: 8 rows for 4-byte, 16 for 2-byte, 32 for 1-byte dtypes.
    return max(8, 32 // jnp.dtype(dtype).itemsize)


def _footprint_bytes(tm, tf, E, isz):
    """Per-step VMEM footprint for the F-tiled pipeline."""
    return (4 * tm * E * isz          # x + out tiles, double-buffered
            + 4 * E * tf * isz        # W1 (E,tf) + W2 (tf,E) blocks, double-buffered
            + 2 * (tf + E) * isz      # bias blocks
            + tm * E * 4              # f32 accumulator scratch
            + 2 * tm * tf * 4)        # f32 fc1 intermediate + headroom


def _choose_tm(M, tm_target, gran):
    """Largest row tile <= tm_target that is a multiple of `gran`, divides M,
    and (when possible) yields >= 2 grid steps so both v7x TCs get work."""
    if M % gran == 0:
        cands = [t for t in range(gran, min(M, tm_target) + 1, gran) if M % t == 0]
        multi = [t for t in cands if M // t >= 2]
        if multi:
            return max(multi), M
        if cands:
            return max(cands), M
    # Awkward M: fall back to padding (rare; costs one extra activation pass).
    tm = min(((M + gran - 1) // gran) * gran,
             ((tm_target + gran - 1) // gran) * gran)
    m_pad = pl.cdiv(M, tm) * tm
    return tm, m_pad


def _choose_tf(E, F, tm, isz, budget):
    """Full F if the weight pair fits the budget; else largest fitting multiple
    of 128 that divides F (tf must be a multiple of 128 or equal to F)."""
    if _footprint_bytes(tm, F, E, isz) <= budget:
        return F
    cands = [t for t in range(128, F, 128) if F % t == 0]
    fitting = [t for t in cands if _footprint_bytes(tm, t, E, isz) <= budget]
    if fitting:
        return max(fitting)
    return min(cands) if cands else F


def feed_forward_network(x, w1, b1, w2, b2):
    """x: [B, L, E]; w1: [E, F]; b1: [F]; w2: [F, E]; b2: [E] -> [B, L, E].

    Inference-mode FFN (dropout == identity).
    """
    B, L, E = x.shape
    F = w1.shape[1]
    M = B * L
    isz = jnp.dtype(x.dtype).itemsize

    vmem_cap = _vmem_capacity_bytes()
    budget = int(0.75 * vmem_cap)            # ~48 MiB on v7x, ~96 MiB on v5e/v6e
    tm_target = 1024 if vmem_cap >= 100 * 1024 * 1024 else 512

    gran = _row_granularity(x.dtype)
    tm, m_pad = _choose_tm(M, tm_target, gran)
    tf = _choose_tf(E, F, tm, isz, budget)
    assert F % tf == 0

    x2d = x.reshape(M, E)
    if m_pad != M:
        x2d = jnp.pad(x2d, ((0, m_pad - M), (0, 0)))
    b1_2d = b1.reshape(1, F)
    b2_2d = b2.reshape(1, E)

    n_m = m_pad // tm
    n_f = F // tf

    # HBM traffic: activations once; weights once per row tile when F is tiled,
    # once total when they are VMEM-resident (constant index_map, no re-DMA).
    weight_passes = 1 if n_f == 1 else n_m
    bytes_accessed = int(2 * m_pad * E * isz
                         + weight_passes * 2 * E * F * isz
                         + (E + F) * isz)
    cost = pl.CostEstimate(flops=4 * m_pad * E * F,
                           transcendentals=m_pad * F,
                           bytes_accessed=bytes_accessed)

    out2d = pl.pallas_call(
        ffn_kernel,
        out_shape=jax.ShapeDtypeStruct((m_pad, E), x.dtype),
        grid_spec=pltpu.PrefetchScalarGridSpec(
            num_scalar_prefetch=0,
            grid=(n_m, n_f),
            in_specs=[
                pl.BlockSpec((tm, E), lambda i, kf: (i, 0)),   # x row tile
                pl.BlockSpec((E, tf), lambda i, kf: (0, kf)),  # W1 column block
                pl.BlockSpec((1, tf), lambda i, kf: (0, kf)),  # b1 block
                pl.BlockSpec((tf, E), lambda i, kf: (kf, 0)),  # W2 row block
                pl.BlockSpec((1, E), lambda i, kf: (0, 0)),    # b2
            ],
            out_specs=pl.BlockSpec((tm, E), lambda i, kf: (i, 0)),
            scratch_shapes=[pltpu.VMEM((tm, E), jnp.float32)],
        ),
        compiler_params=pltpu.CompilerParams(
            dimension_semantics=("parallel", "arbitrary"),
            vmem_limit_bytes=budget,
        ),
        cost_estimate=cost,
    )(x2d, w1, b1_2d, w2, b2_2d)

    if m_pad != M:
        out2d = out2d[:M]
    return out2d.reshape(B, L, E)


def _reference_ffn(x, w1, b1, w2, b2):
    h = jnp.dot(x.astype(jnp.float32), w1.astype(jnp.float32)) + b1.astype(jnp.float32)
    h = 0.5 * h * (1.0 + jax.lax.erf(h * _SQRT_HALF))
    return jnp.dot(h, w2.astype(jnp.float32)) + b2.astype(jnp.float32)


if __name__ == "__main__":
    # Small shapes consistent with the module: batch=2, seq=8, embed=32, ffn=64
    B, L, E, F = 2, 8, 32, 64

    key = jax.random.PRNGKey(0)
    kx, kw1, kb1, kw2, kb2 = jax.random.split(key, 5)

    x = jax.random.normal(kx, (B, L, E), dtype=jnp.float32)

    # Deterministic params (Kaiming-uniform-ish scale like nn.Linear defaults)
    lim1 = 1.0 / math.sqrt(E)
    lim2 = 1.0 / math.sqrt(F)
    w1 = jax.random.uniform(kw1, (E, F), minval=-lim1, maxval=lim1, dtype=jnp.float32)
    b1 = jax.random.uniform(kb1, (F,), minval=-lim1, maxval=lim1, dtype=jnp.float32)
    w2 = jax.random.uniform(kw2, (F, E), minval=-lim2, maxval=lim2, dtype=jnp.float32)
    b2 = jax.random.uniform(kb2, (E,), minval=-lim2, maxval=lim2, dtype=jnp.float32)

    # f32 path: must match the exact-erf reference tightly (dropout = identity).
    out = feed_forward_network(x, w1, b1, w2, b2)
    jax.block_until_ready(out)
    out_ref = _reference_ffn(x, w1, b1, w2, b2)
    assert out.shape == (B, L, E)
    assert jnp.allclose(out, out_ref, atol=1e-5, rtol=1e-5)

    # bf16 path (native-dtype MXU operands, f32 accumulation; GELU output is
    # rounded to bf16 before fc2 -> accepted accuracy tradeoff, loose tolerance).
    xb, w1b, b1b = x.astype(jnp.bfloat16), w1.astype(jnp.bfloat16), b1.astype(jnp.bfloat16)
    w2b, b2b = w2.astype(jnp.bfloat16), b2.astype(jnp.bfloat16)
    out_bf16 = feed_forward_network(xb, w1b, b1b, w2b, b2b)
    jax.block_until_ready(out_bf16)
    ref_bf16 = _reference_ffn(xb, w1b, b1b, w2b, b2b)
    assert out_bf16.dtype == jnp.bfloat16
    assert jnp.allclose(out_bf16.astype(jnp.float32), ref_bf16, atol=5e-2, rtol=5e-2)

    print("KERNEL_OK")
</pallas_src>

<mosaic_0001>
module attributes {stable_mosaic.version = 11 : i64} {
  func.func @ffn_kernel(%arg0: i32, %arg1: i32, %arg2: memref<8x32xf32, #tpu.memory_space<vmem>>, %arg3: memref<32x64xf32, #tpu.memory_space<vmem>>, %arg4: memref<1x64xf32, #tpu.memory_space<vmem>>, %arg5: memref<64x32xf32, #tpu.memory_space<vmem>>, %arg6: memref<1x32xf32, #tpu.memory_space<vmem>>, %arg7: memref<8x32xf32, #tpu.memory_space<vmem>>, %arg8: memref<8x32xf32, #tpu.memory_space<vmem>>) attributes {dimension_semantics = [#tpu.dimension_semantics<parallel>, #tpu.dimension_semantics<arbitrary>], iteration_bounds = array<i64: 2, 1>, scalar_prefetch = 0 : i64, scratch_operands = 1 : i64, tpu.core_type = #tpu.core_type<tc>, window_params = [{transform_indices = @transform_0, window_bounds = array<i64: 8, 32>}, {transform_indices = @transform_1, window_bounds = array<i64: 32, 64>}, {transform_indices = @transform_2, window_bounds = array<i64: 1, 64>}, {transform_indices = @transform_3, window_bounds = array<i64: 64, 32>}, {pipeline_mode = #tpu.pipeline_mode<synchronous>, transform_indices = @transform_4, window_bounds = array<i64: 1, 32>}, {transform_indices = @transform_5, window_bounds = array<i64: 8, 32>}]} {
    %c0_i32 = arith.constant 0 : i32
    %0 = arith.cmpi eq, %arg1, %c0_i32 : i32
    %1 = arith.extui %0 : i1 to i32
    %c0_i32_0 = arith.constant 0 : i32
    %2 = arith.cmpi ne, %1, %c0_i32_0 : i32
    scf.if %2 {
      %cst_18 = arith.constant 0.000000e+00 : f32
      %25 = vector.broadcast %cst_18 : f32 to vector<8x32xf32>
      %c0_19 = arith.constant 0 : index
      %c0_20 = arith.constant 0 : index
      %26 = vector.load %arg8[%c0_19, %c0_20] : memref<8x32xf32, #tpu.memory_space<vmem>>, vector<8x32xf32>
      tpu.vector_store %arg8[%c0_19, %c0_20], %25 {strides = array<i32>} : memref<8x32xf32, #tpu.memory_space<vmem>>, vector<8x32xf32>,
    } else {
    }
    %c0 = arith.constant 0 : index
    %c0_1 = arith.constant 0 : index
    %3 = vector.load %arg2[%c0, %c0_1] : memref<8x32xf32, #tpu.memory_space<vmem>>, vector<8x32xf32>
    %c0_2 = arith.constant 0 : index
    %c0_3 = arith.constant 0 : index
    %4 = vector.load %arg3[%c0_2, %c0_3] : memref<32x64xf32, #tpu.memory_space<vmem>>, vector<32x64xf32>
    %cst = arith.constant dense<0.000000e+00> : vector<8x64xf32>
    %5 = tpu.matmul %3, %4, %cst {dimension_numbers = #tpu.dot_dimension_numbers<[1], [0], [0], [1], [0, 0, 1, 1], [], []>} : vector<8x32xf32>, vector<32x64xf32>, vector<8x64xf32> -> vector<8x64xf32>
    %c0_4 = arith.constant 0 : index
    %c0_5 = arith.constant 0 : index
    %6 = vector.load %arg4[%c0_4, %c0_5] : memref<1x64xf32, #tpu.memory_space<vmem>>, vector<1x64xf32>
    %7 = vector.broadcast %6 : vector<1x64xf32> to vector<8x64xf32>
    %8 = arith.addf %5, %7 : vector<8x64xf32>
    %cst_6 = arith.constant 5.000000e-01 : f32
    %9 = vector.broadcast %cst_6 : f32 to vector<8x64xf32>
    %10 = arith.mulf %9, %8 : vector<8x64xf32>
    %cst_7 = arith.constant 0.707106769 : f32
    %11 = vector.broadcast %cst_7 : f32 to vector<8x64xf32>
    %12 = arith.mulf %8, %11 : vector<8x64xf32>
    %13 = math.erf %12 : vector<8x64xf32>
    %cst_8 = arith.constant 1.000000e+00 : f32
    %14 = vector.broadcast %cst_8 : f32 to vector<8x64xf32>
    %15 = arith.addf %14, %13 : vector<8x64xf32>
    %16 = arith.mulf %10, %15 : vector<8x64xf32>
    %c0_9 = arith.constant 0 : index
    %c0_10 = arith.constant 0 : index
    %17 = vector.load %arg8[%c0_9, %c0_10] : memref<8x32xf32, #tpu.memory_space<vmem>>, vector<8x32xf32>
    %c0_11 = arith.constant 0 : index
    %c0_12 = arith.constant 0 : index
    %18 = vector.load %arg5[%c0_11, %c0_12] : memref<64x32xf32, #tpu.memory_space<vmem>>, vector<64x32xf32>
    %cst_13 = arith.constant dense<0.000000e+00> : vector<8x32xf32>
    %19 = tpu.matmul %16, %18, %cst_13 {dimension_numbers = #tpu.dot_dimension_numbers<[1], [0], [0], [1], [0, 0, 1, 1], [], []>} : vector<8x64xf32>, vector<64x32xf32>, vector<8x32xf32> -> vector<8x32xf32>
    %20 = arith.addf %17, %19 : vector<8x32xf32>
    %c0_14 = arith.constant 0 : index
    %c0_15 = arith.constant 0 : index
    %21 = vector.load %arg8[%c0_14, %c0_15] : memref<8x32xf32, #tpu.memory_space<vmem>>, vector<8x32xf32>
    tpu.vector_store %arg8[%c0_14, %c0_15], %20 {strides = array<i32>} : memref<8x32xf32, #tpu.memory_space<vmem>>, vector<8x32xf32>,
    %c0_i32_16 = arith.constant 0 : i32
    %22 = arith.cmpi eq, %arg1, %c0_i32_16 : i32
    %23 = arith.extui %22 : i1 to i32
    %c0_i32_17 = arith.constant 0 : i32
    %24 = arith.cmpi ne, %23, %c0_i32_17 : i32
    scf.if %24 {
      %c0_18 = arith.constant 0 : index
      %c0_19 = arith.constant 0 : index
      %25 = vector.load %arg8[%c0_18, %c0_19] : memref<8x32xf32, #tpu.memory_space<vmem>>, vector<8x32xf32>
      %c0_20 = arith.constant 0 : index
      %c0_21 = arith.constant 0 : index
      %26 = vector.load %arg6[%c0_20, %c0_21] : memref<1x32xf32, #tpu.memory_space<vmem>>, vector<1x32xf32>
      %27 = vector.broadcast %26 : vector<1x32xf32> to vector<8x32xf32>
      %28 = arith.addf %25, %27 : vector<8x32xf32>
      %c0_22 = arith.constant 0 : index
      %c0_23 = arith.constant 0 : index
      %29 = vector.load %arg7[%c0_22, %c0_23] : memref<8x32xf32, #tpu.memory_space<vmem>>, vector<8x32xf32>
      tpu.vector_store %arg7[%c0_22, %c0_23], %28 {strides = array<i32>} : memref<8x32xf32, #tpu.memory_space<vmem>>, vector<8x32xf32>,
    } else {
    }
    return
  }
  func.func @transform_0(%arg0: i32, %arg1: i32) -> (i32, i32) {
    %c0_i32 = arith.constant 0 : i32
    %c0_i32_0 = arith.constant 0 : i32
    return %arg0, %c0_i32 : i32, i32
  }
  func.func @transform_1(%arg0: i32, %arg1: i32) -> (i32, i32) {
    %c0_i32 = arith.constant 0 : i32
    %c0_i32_0 = arith.constant 0 : i32
    return %c0_i32, %arg1 : i32, i32
  }
  func.func @transform_2(%arg0: i32, %arg1: i32) -> (i32, i32) {
    %c0_i32 = arith.constant 0 : i32
    %c0_i32_0 = arith.constant 0 : i32
    return %c0_i32, %arg1 : i32, i32
  }
  func.func @transform_3(%arg0: i32, %arg1: i32) -> (i32, i32) {
    %c0_i32 = arith.constant 0 : i32
    %c0_i32_0 = arith.constant 0 : i32
    return %arg1, %c0_i32 : i32, i32
  }
  func.func @transform_4(%arg0: i32, %arg1: i32) -> (i32, i32) {
    %c0_i32 = arith.constant 0 : i32
    %c0_i32_0 = arith.constant 0 : i32
    %c0_i32_1 = arith.constant 0 : i32
    return %c0_i32, %c0_i32_0 : i32, i32
  }
  func.func @transform_5(%arg0: i32, %arg1: i32) -> (i32, i32) {
    %c0_i32 = arith.constant 0 : i32
    %c0_i32_0 = arith.constant 0 : i32
    return %arg0, %c0_i32 : i32, i32
  }
}

</mosaic_0001>

<bundles_post_ra>
// kernel: tpu_custom_call.1
= control target key start
LH: loop header
LB: loop body
LE: loop exit
PB: predicated region body
PF: predicated region fallthrough
CT: control target
= control target key end

     0   :  { %10 = vsyncpa [#allocation4], 0  ;;  %s980_s0 = inlined_call_operand.vmem [shape: f32[16,32], index: 0, kind: input, shape index: {}]   ;;  %s981_s1 = inlined_call_operand.vmem [shape: f32[32,64], index: 1, kind: input, shape index: {}]   ;;  %s982_s2 = inlined_call_operand.vmem [shape: f32[1,64], index: 2, kind: input, shape index: {}]   ;;  %s983_s3 = inlined_call_operand.vmem [shape: f32[64,32], index: 3, kind: input, shape index: {}]   ;;  %s984_s4 = inlined_call_operand.vmem [shape: f32[1,32], index: 4, kind: input, shape index: {}]   ;;  %s985_s5 = inlined_call_operand.hbm [shape: f32[16,32], index: 5, kind: output, shape index: {}]  }
   0x1   :  { %12 = vsyncpa [#allocation4 + $0x1], 0  ;;  %s835_s18 = smov 0   ;;  %s837_s19 = smov 0  }
   0x2   :  { %s839_s20 = smov 0   ;;  %s841_s21 = smov 0  }
   0x3   :  { %s843_s22 = smov 0   ;;  %s845_s23 = smov 0  }
   0x4 LB: > { %s603_s24 = sadd.s32 4294967295, %s800_s23   ;;  %s604_s25 = sadd.s32 4294967294, %s800_s23   ;;  %s800_s23 = sphi %s845_s23, %s18_s23   ;;  %s796_s22 = sphi %s843_s22, %s992_s22   ;;  %s792_s21 = sphi %s841_s21, %s991_s21   ;;  %s788_s20 = sphi %s839_s20, %s990_s20   ;;  %s784_s19 = sphi %s837_s19, %s989_s19   ;;  %s780_s18 = sphi %s835_s18, %s988_s18  }
   0x5   : > { %s30_s26 = sadd.s32 1, %s796_s22  ;;  %s162_s27 = sadd.s32 1, %s788_s20 }
   0x6   : > { %p32_p0 = scmp.ge.s32.totalorder %s30_s26, 2  ;;  %p172_p1 = scmp.ne.s32.totalorder %s788_s20, %s784_s19 }
   0x7   : > { %p173_p2 = scmp.eq.s32.totalorder %s603_s24, 1  ;;  %p178_p3 = scmp.ne.s32.totalorder %s784_s19, %s780_s18 }
   0x8   : > { %s994_s26 = smov (%p32_p0, %s30_s26), 0  ;;  %p179_p5 = scmp.eq.s32.totalorder %s604_s25, 1 }
   0x9   : > { %p875_p4 = por %p173_p2, %p172_p1  ;;  %s159_s29 = ssub.s32 %s796_s22, %s994_s26 }
   0xa   : > { %p610_p6 = scmp.ge.s32.totalorder %s800_s23, 1  ;;  %p160_p7 = scmp.eq.s32.totalorder %s159_s29, 0 }
   0xb   : > { %p882_p8 = por %p179_p5, %p178_p3  ;;  %p229_p9 = scmp.lt.s32.totalorder %s800_s23, 3 }
   0xc   : > { %s888_s6 = scalar_select %p160_p7, %s788_s20, %s162_s27  }
   0xd   : > { %p230_p10 = pnand %p610_p6, %p229_p9 }
   0xe   : > { %p268_p11 = scmp.lt.s32.totalorder (!%p230_p10), %s792_s21, 1  ;;  %s265_s8 = sand.u32 (!%p230_p10), 1, %s784_s19  }
   0xf   : > { %233 = sbr.rel (%p230_p10) target bundleno = 462 (0x1ce), region = 40  ;;  %s611_s9 = sshll.u32 (!%p230_p10), %s265_s8, 3 }
  0x10   : > { %s618_s12 = sshll.u32 (!%p230_p10), %s792_s21, 7  ;;  %s267_s13 = scalar_lea.vmem (!%p230_p10), [#allocation3], %s611_s9 }
  0x11   : > { %s492_s17 = scalar_lea.hbm (!%p230_p10), %s985_s5, %s618_s12  ;;  %s481_s24 = scalar_lea.sflag (!%p230_p10), [#allocation4], %s265_s8 }
  0x12   : > { %s804_s27 = smov (!%p230_p10), [#allocation3]  }
  0x13   : > { %s728_s29 = sshll.u32 (!%p230_p10), %s804_s27, 4  ;;  %s729_s29 = int_to_ptr.vmem [resolvable:$false] %s728_s29 }
  0x14   : > { %v295_v0 = vld [vmem:[%s981_s1 + $0x18] sm:$0xff]  ;;  %v802_v1 = vmov 0.0   ;;  %v294_v2 = vld [vmem:[%s981_s1 + $0x10] sm:$0xff]  ;;  %vm803_vm0 = vmmov 0   ;;  %vm289_vm1 = vcmask 261120   ;;  %s269_s11 = scalar_select %p268_p11, %s792_s21, 1 }
  0x15   : > { %635 = vmatprep.subr.mxu0 %v802_v1  ;;  %643 = vmatprep.mubr.msk.f32.mxu0 %vm803_vm0, %v802_v1  ;;  %290 = vst.msk [vmem:[#allocation2] sm:$0xff] %vm289_vm1, %v802_v1  ;;  %v293_v3 = vld [vmem:[%s981_s1 + $0x8] sm:$0xff]  ;;  %v292_v4 = vld [vmem:[%s981_s1] sm:$0xff]  ;;  %v390_v6 = vld [vmem:[%s983_s3 + $0x38] sm:$0xff]  ;;  %vm391_vm2 = vcmask 523264   ;;  %s730_s21 = scalar_lea.vmem %s729_s29, 256 }
  0x16   : > { %636 = vmatpush3.msra.mxu0 %v295_v0  ;;  %646 = vmatprep.subr.mxu1 %v802_v1  ;;  %s612_s14 = sshll.u32 %s269_s11, 3  ;;  %v389_v7 = vld [vmem:[%s983_s3 + $0x30] sm:$0xff]  ;;  %v388_v8 = vld [vmem:[%s983_s3 + $0x28] sm:$0xff]  ;;  %v387_v9 = vld [vmem:[%s983_s3 + $0x20] sm:$0xff] }
  0x17   : > { %637 = vmatprep.subr.mxu0 %v802_v1  ;;  %662 = vmatprep.mubr.msk.f32.mxu1 %vm803_vm0, %v802_v1  ;;  %s271_s25 = scalar_lea.vmem %s980_s0, %s612_s14  ;;  %v386_v10 = vld [vmem:[%s983_s3 + $0x18] sm:$0xff]  ;;  %v385_v11 = vld [vmem:[%s983_s3 + $0x10] sm:$0xff]  ;;  %v384_v12 = vld [vmem:[%s983_s3 + $0x8] sm:$0xff]  ;;  %s494_s14 = sshll.u32 %s267_s13, 4  ;;  %s495_s14 = int_to_ptr.vmem [resolvable:$true] %s494_s14 }
  0x18   : > { %638 = vmatpush3.msra.mxu0 %v294_v2  ;;  %v291_v5 = vld [vmem:[%s271_s25] sm:$0xff]  ;;  %647 = vmatpush3.msra.mxu1 %v390_v6  ;;  %s724_s25 = scalar_lea.vmem %s495_s14, 128  ;;  %p731_p1 = scmp.lt.s32.totalorder %s495_s14, %s729_s29 }
  0x19   : > { %639 = vmatprep.subr.mxu0 %v802_v1  ;;  %648 = vmatprep.subr.mxu1 %v802_v1  ;;  %v383_v13 = vld [vmem:[%s983_s3] sm:$0xff]  ;;  %p725_p12 = scmp.ne.s32.totalorder %s495_s14, %s724_s25  ;;  %p732_p2 = scmp.lt.s32.totalorder %s730_s21, %s724_s25 }
  0x1a   : > { %640 = vmatpush3.msra.mxu0 %v293_v3  ;;  %649 = vmatpush3.msra.mxu1 %v389_v7  ;;  %v613_v14 = vld [vmem:[%s982_s2] ss:$0 sm:$0xff] }
  0x1b   : > { %641 = vmatprep.subr.mxu0 %v802_v1  ;;  %650 = vmatprep.subr.mxu1 %v802_v1  ;;  %v616_v27 = vld [vmem:[%s984_s4] ss:$0 sm:$0xff]  ;;  %p726_p13 = pnand %p725_p12, %p875_p4  ;;  %p733_p3 = por %p732_p2, %p731_p1 }
  0x1c   : > { %642 = vmatpush3.msra.mxu0 %v292_v4  ;;  %651 = vmatpush3.msra.mxu1 %v388_v8  ;;  %v382_v23 = vld [vmem:[#allocation2] sm:$0xff] }
  0x1d   : > { %644 = vmatmul.mubr.msk.f32.vlgmr.msra.gmra.mxu0 %vm289_vm1, %v291_v5  ;;  %652 = vmatprep.subr.mxu1 %v802_v1  ;;  %p727_p0 = pneg %p726_p13 }
  0x1e   : > { %653 = vmatpush3.msra.mxu1 %v387_v9 }
  0x1f   : > { %654 = vmatprep.subr.mxu1 %v802_v1  ;;  %p734_p5 = pnand %p733_p3, %p727_p0 }
  0x20   : > { %655 = vmatpush3.msra.mxu1 %v386_v10 }
  0x21   : > { %656 = vmatprep.subr.mxu1 %v802_v1 }
  0x22   : > { %657 = vmatpush3.msra.mxu1 %v385_v11 }
  0x23   : > { %658 = vmatprep.subr.mxu1 %v802_v1 }
  0x24   : > { %659 = vmatpush3.msra.mxu1 %v384_v12 }
  0x25   : > { %660 = vmatprep.subr.mxu1 %v802_v1 }
  0x26   : > { %661 = vmatpush3.msra.mxu1 %v383_v13 }
  0xdd   : > { %v373_v15 = vpop.f32.mrf.mxu0 }
  0xde   : > { %v374_v16 = vadd.f32 %v613_v14, %v373_v15 }
  0xdf   : > { %v645_v17 = vpop.f32.mrf.mxu0 }
  0xe0   : > { %v378_v18 = vmul.f32 0.70710677, %v374_v16  ;;  %v377_v20 = vmul.f32 0.5, %v374_v16 }
  0xe2   : > { %722 = verf.f32 %v378_v18 }
  0xef   : > { %v723_v19 = vpop.eup %722 }
  0xf0   : > { %v380_v21 = vadd.f32 1.0, %v723_v19 }
  0xf2   : > { %v381_v22 = vmul.f32 %v380_v21, %v377_v20 }
  0xf4   : > { %663 = vmatmul.mubr.msk.f32.vlgmr.msra.gmra.mxu1 %vm391_vm2, %v381_v22 }
 0x1b4   : > { %v461_v24 = vpop.f32.mrf.mxu1 }
 0x1b5   : > { %v465_v25 = vadd.f32 %v461_v24, %v382_v23 }
 0x1b6   : > { %v664_v26 = vpop.f32.mrf.mxu1 }
 0x1b7   : > { %466 = vst.msk [vmem:[#allocation2] sm:$0xff] %vm289_vm1, %v465_v25 }
 0x1be   : > { %v470_v28 = vld [vmem:[#allocation2] sm:$0xff] }
 0x1bf   : > { %v478_v29 = vadd.f32 %v616_v27, %v470_v28 }
 0x1c1   : > { %479 = vst.msk [vmem:[%s267_s13] sm:$0xff] %vm289_vm1, %v478_v29 }
 0x1c2   : > { %737 = shalt.err (!%p734_p5)
}
 0x1c3   : > { %s738_s7 = scalar_lea.hbm %s492_s17, 128  ;;  %s742_s10 = scalar_lea.hbm %s985_s5, 256 }
 0x1c4   : > { %p739_p6 = scmp.ne.s32.totalorder %s492_s17, %s738_s7  ;;  %p743_p10 = scmp.lt.s32.totalorder %s492_s17, %s985_s5 }
 0x1c5   : > { %p744_p11 = scmp.lt.s32.totalorder %s742_s10, %s738_s7 }
 0x1c6   : > { %p740_p7 = pnand %p739_p6, %p875_p4 }
 0x1c7   : > { %p745_p12 = por %p744_p11, %p743_p10 }
 0x1c8   : > { %p741_p9 = pneg %p740_p7 }
 0x1ca   : > { %p746_p13 = pnand %p745_p12, %p741_p9 }
 0x1cc   : > { %749 = shalt.err (!%p746_p13)
}
 0x1cd   : > { %665 = dma.vmem_to_hbm [thread:$0]  (%p875_p4), %s495_s14, 128, %s492_s17, %s481_s24  }
 0x1ce PF: > { %p671_p0 = scmp.ge.s32.totalorder %s800_s23, 2  ;;  %s506_s13 = sand.u32 1, %s780_s18  }
 0x1cf   : > { %s507_s15 = scalar_lea.sflag [#allocation4], %s506_s13 }
 0x1d0   : > { %p668_p1 = pnand %p671_p0, %p882_p8 }
 0x1d2   : > { %p669_p2 = pneg %p668_p1 }
 0x1d4   : > { %775 = dma.done.wait (%p669_p2), %s507_s15, 128  }
 0x1d5   : > { %777 = vsyncadd (%p669_p2), %s507_s15, 4294967168  ;;  %s18_s23 = sadd.s32 1, %s800_s23   ;;  %s988_s18 = smov %s784_s19 }
 0x1d6   : > { %p15_p3 = scmp.ge.s32.totalorder %s18_s23, 4   ;;  %s989_s19 = smov %s788_s20 }
 0x1d7   : > { %s990_s20 = smov %s888_s6  ;;  %s991_s21 = smov %s796_s22 }
 0x1d8   : > { %s992_s22 = smov %s994_s26  ;;  %17 = sbr.rel (!%p15_p3) target bundleno = 4 (0x4), region = 92 }
 0x1dd   :  { %512 = vsyncpa [#allocation4], 1 }
 0x1de   :  { %514 = vsyncpa [#allocation4 + $0x1], 1 }

</bundles_post_ra>
